<compile_context>
chip_gen: v7x
topology: tpu7x:2x2x1
jax: 0.10.0
libtpu: 0.0.40
codegen_flags: <defaults>
</compile_context>

<pallas_src>
import jax
import jax.numpy as jnp
from jax.experimental import pallas as pl
from jax.experimental.pallas import tpu as pltpu

_P = 1e-6
_INV_1P = 1.0 / (1.0 + _P)
_LANE = 128


def _gumbel_sigmoid_math(x, u_x, u_r):
    """Fused Gumbel-sigmoid: sigmoid(a - b) using 4 logs + 1 tanh per element."""
    xf = x.astype(jnp.float32)
    # Inner negative log of the double-negative-log Gumbel noise (p_value
    # placement identical to the PyTorch module).
    t_x = -jnp.log(u_x + _P) + _P
    t_r = -jnp.log(u_r + _P) + _P
    num = (xf + _P) * t_r
    den = (1.0 - xf + _P) * t_x
    d = (jnp.log(num) - jnp.log(den)) * _INV_1P
    # softmax([a, b], -1)[..., 0] == sigmoid(a - b) == 0.5*(tanh(0.5*(a-b)) + 1)
    return 0.5 * (jnp.tanh(0.5 * d) + 1.0)


def _kernel_onchip_prng(seed_ref, x_ref, o_ref):
    # Per-tile seed: decorrelated noise across grid steps, deterministic
    # regardless of which TensorCore runs the tile ("parallel" axis).
    pltpu.prng_seed(seed_ref[0] + pl.program_id(0))
    shape = x_ref.shape
    bits_x = pltpu.bitcast(pltpu.prng_random_bits(shape), jnp.uint32)
    bits_r = pltpu.bitcast(pltpu.prng_random_bits(shape), jnp.uint32)
    # Uniform [0,1) via mantissa bit-trick: build [1,2) then subtract 1.0 —
    # no int->float convert instruction needed.
    u_x = pltpu.bitcast((bits_x >> 9) | jnp.uint32(0x3F800000), jnp.float32) - 1.0
    u_r = pltpu.bitcast((bits_r >> 9) | jnp.uint32(0x3F800000), jnp.float32) - 1.0
    o_ref[...] = _gumbel_sigmoid_math(x_ref[...], u_x, u_r).astype(o_ref.dtype)


def _kernel_streamed_noise(x_ref, ux_ref, ur_ref, o_ref):
    o_ref[...] = _gumbel_sigmoid_math(
        x_ref[...], ux_ref[...], ur_ref[...]
    ).astype(o_ref.dtype)


def gumbel_sigmoid(x, seed=0, *, tile_rows=2048):
    orig_shape = x.shape
    orig_dtype = x.dtype

    flat = x.reshape(-1)
    total = flat.shape[0]

    # Lane-dense 2-D layout, rows rounded up to the sublane multiple (8).
    rows = max(pl.cdiv(total, _LANE), 8)
    rows = ((rows + 7) // 8) * 8
    tile_r = min(tile_rows, rows)
    tile_r = max(8, (tile_r // 8) * 8)
    num_tiles = pl.cdiv(rows, tile_r)
    rows_padded = num_tiles * tile_r
    padded_total = rows_padded * _LANE

    if padded_total != total:
        flat = jnp.pad(flat, (0, padded_total - total))
    x2d = flat.reshape(rows_padded, _LANE)

    n = padded_total
    itemsize = jnp.dtype(orig_dtype).itemsize
    out_shape = jax.ShapeDtypeStruct((rows_padded, _LANE), orig_dtype)
    # Same index_map works with or without the scalar-prefetch trailing ref.
    data_spec = pl.BlockSpec((tile_r, _LANE), lambda i, *_: (i, 0))

    if jax.default_backend() == "tpu":
        cost = pl.CostEstimate(
            flops=10 * n, transcendentals=5 * n, bytes_accessed=2 * n * itemsize
        )
        seed_arr = jnp.asarray([seed], dtype=jnp.int32)
        out2d = pl.pallas_call(
            _kernel_onchip_prng,
            out_shape=out_shape,
            grid_spec=pltpu.PrefetchScalarGridSpec(
                num_scalar_prefetch=1,
                grid=(num_tiles,),
                in_specs=[data_spec],
                out_specs=data_spec,
            ),
            compiler_params=pltpu.CompilerParams(
                dimension_semantics=("parallel",),
            ),
            cost_estimate=cost,
        )(seed_arr, x2d)
    else:
        # TODO(synk): pltpu.prng_seed / prng_random_bits have no lowering off-TPU
        # (interpret/CPU); stream jax.random uniforms through the same tiled kernel.
        kx, kr = jax.random.split(jax.random.PRNGKey(seed))
        u_x = jax.random.uniform(kx, (rows_padded, _LANE), dtype=jnp.float32)
        u_r = jax.random.uniform(kr, (rows_padded, _LANE), dtype=jnp.float32)
        cost = pl.CostEstimate(
            flops=10 * n,
            transcendentals=5 * n,
            bytes_accessed=2 * n * itemsize + 8 * n,
        )
        out2d = pl.pallas_call(
            _kernel_streamed_noise,
            out_shape=out_shape,
            grid_spec=pltpu.PrefetchScalarGridSpec(
                num_scalar_prefetch=0,
                grid=(num_tiles,),
                in_specs=[data_spec, data_spec, data_spec],
                out_specs=data_spec,
            ),
            compiler_params=pltpu.CompilerParams(
                dimension_semantics=("parallel",),
            ),
            cost_estimate=cost,
        )(x2d, u_x, u_r)

    out = out2d.reshape(-1)
    if padded_total != total:
        out = out[:total]
    return out.reshape(orig_shape)


if __name__ == "__main__":
    key = jax.random.PRNGKey(0)
    # Probability-like NCHW map in [0, 1].
    x = jax.random.uniform(key, (2, 4, 16, 16), dtype=jnp.float32)

    y = gumbel_sigmoid(x, seed=0)
    y = jax.block_until_ready(y)

    assert y.shape == x.shape, (y.shape, x.shape)
    assert y.dtype == x.dtype, (y.dtype, x.dtype)
    assert bool(jnp.all(jnp.isfinite(y)))
    assert bool(jnp.all((y >= 0.0) & (y <= 1.0)))

    print("KERNEL_OK")
</pallas_src>

<mosaic_0001>
module attributes {stable_mosaic.version = 11 : i64} {
  func.func @_kernel_streamed_noise(%arg0: i32, %arg1: memref<16x128xf32, #tpu.memory_space<vmem>>, %arg2: memref<16x128xf32, #tpu.memory_space<vmem>>, %arg3: memref<16x128xf32, #tpu.memory_space<vmem>>, %arg4: memref<16x128xf32, #tpu.memory_space<vmem>>) attributes {dimension_semantics = [#tpu.dimension_semantics<parallel>], iteration_bounds = array<i64: 1>, scalar_prefetch = 0 : i64, scratch_operands = 0 : i64, tpu.core_type = #tpu.core_type<tc>, window_params = [{transform_indices = @transform_0, window_bounds = array<i64: 16, 128>}, {transform_indices = @transform_1, window_bounds = array<i64: 16, 128>}, {transform_indices = @transform_2, window_bounds = array<i64: 16, 128>}, {transform_indices = @transform_3, window_bounds = array<i64: 16, 128>}]} {
    %c0 = arith.constant 0 : index
    %c0_0 = arith.constant 0 : index
    %0 = vector.load %arg1[%c0, %c0_0] : memref<16x128xf32, #tpu.memory_space<vmem>>, vector<16x128xf32>
    %c0_1 = arith.constant 0 : index
    %c0_2 = arith.constant 0 : index
    %1 = vector.load %arg2[%c0_1, %c0_2] : memref<16x128xf32, #tpu.memory_space<vmem>>, vector<16x128xf32>
    %c0_3 = arith.constant 0 : index
    %c0_4 = arith.constant 0 : index
    %2 = vector.load %arg3[%c0_3, %c0_4] : memref<16x128xf32, #tpu.memory_space<vmem>>, vector<16x128xf32>
    %cst = arith.constant 9.99999997E-7 : f32
    %3 = vector.broadcast %cst : f32 to vector<16x128xf32>
    %4 = arith.addf %1, %3 : vector<16x128xf32>
    %5 = math.log %4 : vector<16x128xf32>
    %cst_5 = arith.constant 0.000000e+00 : f32
    %6 = vector.broadcast %cst_5 : f32 to vector<16x128xf32>
    %7 = arith.subf %6, %5 : vector<16x128xf32>
    %cst_6 = arith.constant 9.99999997E-7 : f32
    %8 = vector.broadcast %cst_6 : f32 to vector<16x128xf32>
    %9 = arith.addf %7, %8 : vector<16x128xf32>
    %cst_7 = arith.constant 9.99999997E-7 : f32
    %10 = vector.broadcast %cst_7 : f32 to vector<16x128xf32>
    %11 = arith.addf %2, %10 : vector<16x128xf32>
    %12 = math.log %11 : vector<16x128xf32>
    %cst_8 = arith.constant 0.000000e+00 : f32
    %13 = vector.broadcast %cst_8 : f32 to vector<16x128xf32>
    %14 = arith.subf %13, %12 : vector<16x128xf32>
    %cst_9 = arith.constant 9.99999997E-7 : f32
    %15 = vector.broadcast %cst_9 : f32 to vector<16x128xf32>
    %16 = arith.addf %14, %15 : vector<16x128xf32>
    %cst_10 = arith.constant 9.99999997E-7 : f32
    %17 = vector.broadcast %cst_10 : f32 to vector<16x128xf32>
    %18 = arith.addf %0, %17 : vector<16x128xf32>
    %19 = arith.mulf %18, %16 : vector<16x128xf32>
    %cst_11 = arith.constant 1.000000e+00 : f32
    %20 = vector.broadcast %cst_11 : f32 to vector<16x128xf32>
    %21 = arith.subf %20, %0 : vector<16x128xf32>
    %cst_12 = arith.constant 9.99999997E-7 : f32
    %22 = vector.broadcast %cst_12 : f32 to vector<16x128xf32>
    %23 = arith.addf %21, %22 : vector<16x128xf32>
    %24 = arith.mulf %23, %9 : vector<16x128xf32>
    %25 = math.log %19 : vector<16x128xf32>
    %26 = math.log %24 : vector<16x128xf32>
    %27 = arith.subf %25, %26 : vector<16x128xf32>
    %cst_13 = arith.constant 0.999998986 : f32
    %28 = vector.broadcast %cst_13 : f32 to vector<16x128xf32>
    %29 = arith.mulf %27, %28 : vector<16x128xf32>
    %cst_14 = arith.constant 5.000000e-01 : f32
    %30 = vector.broadcast %cst_14 : f32 to vector<16x128xf32>
    %31 = arith.mulf %30, %29 : vector<16x128xf32>
    %32 = math.tanh %31 : vector<16x128xf32>
    %cst_15 = arith.constant 1.000000e+00 : f32
    %33 = vector.broadcast %cst_15 : f32 to vector<16x128xf32>
    %34 = arith.addf %32, %33 : vector<16x128xf32>
    %cst_16 = arith.constant 5.000000e-01 : f32
    %35 = vector.broadcast %cst_16 : f32 to vector<16x128xf32>
    %36 = arith.mulf %35, %34 : vector<16x128xf32>
    %c0_17 = arith.constant 0 : index
    %c0_18 = arith.constant 0 : index
    %37 = vector.load %arg4[%c0_17, %c0_18] : memref<16x128xf32, #tpu.memory_space<vmem>>, vector<16x128xf32>
    tpu.vector_store %arg4[%c0_17, %c0_18], %36 {strides = array<i32>} : memref<16x128xf32, #tpu.memory_space<vmem>>, vector<16x128xf32>,
    return
  }
  func.func @transform_0(%arg0: i32) -> (i32, i32) {
    %c0_i32 = arith.constant 0 : i32
    %c0_i32_0 = arith.constant 0 : i32
    return %arg0, %c0_i32 : i32, i32
  }
  func.func @transform_1(%arg0: i32) -> (i32, i32) {
    %c0_i32 = arith.constant 0 : i32
    %c0_i32_0 = arith.constant 0 : i32
    return %arg0, %c0_i32 : i32, i32
  }
  func.func @transform_2(%arg0: i32) -> (i32, i32) {
    %c0_i32 = arith.constant 0 : i32
    %c0_i32_0 = arith.constant 0 : i32
    return %arg0, %c0_i32 : i32, i32
  }
  func.func @transform_3(%arg0: i32) -> (i32, i32) {
    %c0_i32 = arith.constant 0 : i32
    %c0_i32_0 = arith.constant 0 : i32
    return %arg0, %c0_i32 : i32, i32
  }
}

</mosaic_0001>

<bundles_post_ra>
// kernel: tpu_custom_call.1
= control target key start
LH: loop header
LB: loop body
LE: loop exit
PB: predicated region body
PF: predicated region fallthrough
CT: control target
= control target key end

     0   :  { %8 = vsyncpa [#allocation3], 0  ;;  %s345_s0 = inlined_call_operand.hbm [shape: f32[16,128], index: 0, kind: input, shape index: {}]   ;;  %s346_s1 = inlined_call_operand.hbm [shape: f32[16,128], index: 1, kind: input, shape index: {}]   ;;  %s347_s2 = inlined_call_operand.hbm [shape: f32[16,128], index: 2, kind: input, shape index: {}]   ;;  %s348_s3 = inlined_call_operand.hbm [shape: f32[16,128], index: 3, kind: output, shape index: {}]  }
   0x1   :  { %9 = vsyncpa [#allocation6], 0 }
   0x2   :  { %10 = vsyncpa [#allocation4], 0  ;;  %s252_s12 = smov [#allocation5]   ;;  %s253_s14 = smov [#allocation2]  }
   0x3   :  { %s28_s13 = sshll.u32 %s252_s12, 4  ;;  %s16_s15 = sshll.u32 %s253_s14, 4  ;;  %s29_s13 = int_to_ptr.vmem [resolvable:$true] %s28_s13  ;;  %s278_s15 = int_to_ptr.vmem [resolvable:$true] %s16_s15 }
   0x4   :  { %s158_s18 = scalar_lea.hbm %s346_s1, 256 }
   0x5   :  { %p159_p0 = scmp.ne.s32.totalorder %s346_s1, %s158_s18  ;;  %p162_p1 = scmp.lt.u32.totalorder %s158_s18, %s346_s1 }
   0x7   :  { %p164_p2 = pnand %p162_p1, %p159_p0 }
   0x9   :  { %167 = shalt.err (!%p164_p2)
}
   0xa   :  { %s168_s23 = scalar_lea.vmem %s29_s13, 256  ;;  %p173_p4 = scmp.lt.s32.totalorder %s29_s13, %s29_s13 }
   0xb   :  { %p169_p3 = scmp.ne.s32.totalorder %s29_s13, %s168_s23  ;;  %p174_p5 = scmp.lt.s32.totalorder %s168_s23, %s168_s23 }
   0xd   :  { %p175_p6 = por %p174_p5, %p173_p4 }
   0xf   :  { %p176_p7 = pnand %p175_p6, %p169_p3 }
  0x11   :  { %179 = shalt.err (!%p176_p7)
}
  0x12   :  { %s254_s24 = smov 128   ;;  %s255_s25 = smov 8  }
  0x13   :  { %34 = dma.hbm_to_vmem [thread:$0]  %s346_s1, 256, %s29_s13, [#allocation6], %s254_s24, %s254_s24, %s255_s25  }
  0x14   :  { %s180_s30 = scalar_lea.hbm %s345_s0, 256 }
  0x15   :  { %p181_p8 = scmp.ne.s32.totalorder %s345_s0, %s180_s30  ;;  %p184_p9 = scmp.lt.u32.totalorder %s180_s30, %s345_s0 }
  0x17   :  { %p186_p10 = pnand %p184_p9, %p181_p8 }
  0x19   :  { %189 = shalt.err (!%p186_p10)
}
  0x1a   :  { %s190_s8 = scalar_lea.vmem %s278_s15, 256  ;;  %p195_p12 = scmp.lt.s32.totalorder %s278_s15, %s278_s15 }
  0x1b   :  { %p191_p11 = scmp.ne.s32.totalorder %s278_s15, %s190_s8  ;;  %p196_p13 = scmp.lt.s32.totalorder %s190_s8, %s190_s8 }
  0x1d   :  { %p197_p0 = por %p196_p13, %p195_p12 }
  0x1f   :  { %p198_p1 = pnand %p197_p0, %p191_p11 }
  0x21   :  { %201 = shalt.err (!%p198_p1)
}
  0x22   :  { %22 = dma.hbm_to_vmem [thread:$0]  %s345_s0, 256, %s278_s15, [#allocation3], %s254_s24, %s254_s24, %s255_s25  }
  0x23   :  { %s256_s10 = smov [#allocation7]   ;;  %s202_s14 = scalar_lea.hbm %s347_s2, 256 }
  0x24   :  { %s40_s11 = sshll.u32 %s256_s10, 4  ;;  %p203_p2 = scmp.ne.s32.totalorder %s347_s2, %s202_s14  ;;  %s41_s11 = int_to_ptr.vmem [resolvable:$true] %s40_s11 }
  0x25   :  { %p206_p3 = scmp.lt.u32.totalorder %s202_s14, %s347_s2 }
  0x27   :  { %p208_p4 = pnand %p206_p3, %p203_p2 }
  0x29   :  { %211 = shalt.err (!%p208_p4)
}
  0x2a   :  { %s212_s20 = scalar_lea.vmem %s41_s11, 256  ;;  %p217_p6 = scmp.lt.s32.totalorder %s41_s11, %s41_s11 }
  0x2b   :  { %p213_p5 = scmp.ne.s32.totalorder %s41_s11, %s212_s20  ;;  %p218_p7 = scmp.lt.s32.totalorder %s212_s20, %s212_s20 }
  0x2d   :  { %p219_p8 = por %p218_p7, %p217_p6 }
  0x2f   :  { %p220_p9 = pnand %p219_p8, %p213_p5 }
  0x31   :  { %223 = shalt.err (!%p220_p9)
}
  0x32   :  { %46 = dma.hbm_to_vmem [thread:$0]  %s347_s2, 256, %s41_s11, [#allocation6], %s254_s24, %s254_s24, %s255_s25  }
  0x33   :  { %246 = dma.done.wait [#allocation3], 256  }
  0x34   :  { %247 = vsyncadd [#allocation3], 4294967040 }
  0x35   :  { %248 = dma.done.wait [#allocation6], 512  }
  0x36   :  { %249 = vsyncadd [#allocation6], 4294966784  ;;  %v58_v0 = vld [vmem:[#allocation5] sm:$0xff]  ;;  %v60_v1 = vld [vmem:[#allocation7] sm:$0xff]  ;;  %s257_s2 = smov [#allocation8]  }
  0x37   :  { %v62_v2 = vadd.f32 1e-06, %v58_v0  ;;  %v72_v3 = vadd.f32 1e-06, %v60_v1  ;;  %v59_v4 = vld [vmem:[#allocation5 + $0x8] sm:$0xff]  ;;  %v61_v5 = vld [vmem:[#allocation7 + $0x8] sm:$0xff] }
  0x38   :  { %v63_v6 = vadd.f32 1e-06, %v59_v4  ;;  %v73_v7 = vadd.f32 1e-06, %v61_v5  ;;  %v56_v8 = vld [vmem:[#allocation2] sm:$0xff]  ;;  %v57_v9 = vld [vmem:[#allocation2 + $0x8] sm:$0xff] }
  0x39   :  { %138 = vlog2.f32 %v62_v2  ;;  %v86_v10 = vsub.f32 1.0, %v56_v8  ;;  %v87_v14 = vsub.f32 1.0, %v57_v9  ;;  %v82_v22 = vadd.f32 1e-06, %v56_v8  ;;  %s119_s21 = sshll.u32 %s257_s2, 4  ;;  %s120_s21 = int_to_ptr.vmem [resolvable:$true] %s119_s21 }
  0x3a   :  { %140 = vlog2.f32 %v72_v3  ;;  %v83_v29 = vadd.f32 1e-06, %v57_v9  ;;  %s224_s22 = scalar_lea.vmem %s120_s21, 256  ;;  %p229_p11 = scmp.lt.s32.totalorder %s120_s21, %s120_s21 }
  0x3b   :  { %142 = vlog2.f32 %v63_v6  ;;  %v88_v19 = vadd.f32 1e-06, %v86_v10  ;;  %v89_v26 = vadd.f32 1e-06, %v87_v14  ;;  %p225_p10 = scmp.ne.s32.totalorder %s120_s21, %s224_s22  ;;  %p230_p12 = scmp.lt.s32.totalorder %s224_s22, %s224_s22 }
  0x3c   :  { %144 = vlog2.f32 %v73_v7 }
  0x3d   :  { %p231_p13 = por %p230_p12, %p229_p11 }
  0x3f   :  { %p232_p0 = pnand %p231_p13, %p225_p10 }
  0x43   :  { %v139_v11 = vpop.eup %138 }
  0x44   :  { %v141_v12 = vpop.eup %140  ;;  %v65_v13 = vmul.f32 0.6931472, %v139_v11 }
  0x45   :  { %v143_v15 = vpop.eup %142  ;;  %v75_v16 = vmul.f32 0.6931472, %v141_v12 }
  0x46   :  { %v145_v17 = vpop.eup %144  ;;  %v68_v18 = vsub.f32 0.0, %v65_v13  ;;  %v67_v20 = vmul.f32 0.6931472, %v143_v15 }
  0x47   :  { %v78_v21 = vsub.f32 0.0, %v75_v16  ;;  %v77_v23 = vmul.f32 0.6931472, %v145_v17 }
  0x48   :  { %v70_v24 = vadd.f32 1e-06, %v68_v18  ;;  %v69_v25 = vsub.f32 0.0, %v67_v20 }
  0x49   :  { %v80_v27 = vadd.f32 1e-06, %v78_v21  ;;  %v79_v28 = vsub.f32 0.0, %v77_v23 }
  0x4a   :  { %v90_v30 = vmul.f32 %v88_v19, %v70_v24  ;;  %v71_v31 = vadd.f32 1e-06, %v69_v25 }
  0x4b   :  { %v84_v32 = vmul.f32 %v82_v22, %v80_v27  ;;  %v81_v33 = vadd.f32 1e-06, %v79_v28 }
  0x4c   :  { %146 = vlog2.f32 %v90_v30  ;;  %v91_v34 = vmul.f32 %v89_v26, %v71_v31 }
  0x4d   :  { %148 = vlog2.f32 %v84_v32  ;;  %v85_v35 = vmul.f32 %v83_v29, %v81_v33 }
  0x4e   :  { %150 = vlog2.f32 %v91_v34 }
  0x4f   :  { %152 = vlog2.f32 %v85_v35 }
  0x56   :  { %v147_v36 = vpop.eup %146 }
  0x57   :  { %v149_v37 = vpop.eup %148  ;;  %v97_v38 = vmul.f32 0.6931472, %v147_v36 }
  0x58   :  { %v151_v39 = vpop.eup %150  ;;  %v93_v40 = vmul.f32 0.6931472, %v149_v37 }
  0x59   :  { %v153_v41 = vpop.eup %152  ;;  %v99_v42 = vmul.f32 0.6931472, %v151_v39 }
  0x5a   :  { %v100_v43 = vsub.f32 %v93_v40, %v97_v38  ;;  %v95_v44 = vmul.f32 0.6931472, %v153_v41 }
  0x5c   :  { %v102_v45 = vmul.f32 0.999999, %v100_v43  ;;  %v101_v46 = vsub.f32 %v95_v44, %v99_v42 }
  0x5e   :  { %v104_v47 = vmul.f32 0.5, %v102_v45  ;;  %v103_v48 = vmul.f32 0.999999, %v101_v46 }
  0x60   :  { %154 = vtanh.f32 %v104_v47  ;;  %v105_v49 = vmul.f32 0.5, %v103_v48 }
  0x62   :  { %156 = vtanh.f32 %v105_v49 }
  0x6a   :  { %v155_v50 = vpop.eup %154 }
  0x6b   :  { %v108_v51 = vadd.f32 1.0, %v155_v50 }
  0x6c   :  { %v157_v52 = vpop.eup %156 }
  0x6d   :  { %v110_v53 = vmul.f32 0.5, %v108_v51  ;;  %v109_v54 = vadd.f32 1.0, %v157_v52 }
  0x6f   :  { %112 = vst [vmem:[#allocation8] sm:$0xff] %v110_v53  ;;  %v111_v55 = vmul.f32 0.5, %v109_v54 }
  0x71   :  { %113 = vst [vmem:[#allocation8 + $0x8] sm:$0xff] %v111_v55 }
  0x72   :  { %235 = shalt.err (!%p232_p0)
}
  0x73   :  { %s236_s27 = scalar_lea.hbm %s348_s3, 256 }
  0x74   :  { %p237_p1 = scmp.ne.s32.totalorder %s348_s3, %s236_s27  ;;  %p240_p2 = scmp.lt.u32.totalorder %s236_s27, %s348_s3 }
  0x76   :  { %p242_p3 = pnand %p240_p2, %p237_p1 }
  0x78   :  { %245 = shalt.err (!%p242_p3)
}
  0x79   :  { %125 = dma.vmem_to_hbm [thread:$0]  %s120_s21, 256, %s348_s3, [#allocation4], %s254_s24, %s254_s24, %s255_s25  }
  0x7a   :  { %250 = dma.done.wait [#allocation4], 256  }
  0x7b   :  { %251 = vsyncadd [#allocation4], 4294967040 }
  0x7c   :  { %129 = vsyncpa [#allocation3], 1 }
  0x7d   :  { %130 = vsyncpa [#allocation6], 1 }
  0x7e   :  { %131 = vsyncpa [#allocation4], 1 }

</bundles_post_ra>
